<compile_context>
chip_gen: v7x
topology: tpu7x:2x2x1
jax: 0.10.0
libtpu: 0.0.40
codegen_flags: <defaults>
</compile_context>

<pallas_src>
import jax
import jax.numpy as jnp
from jax.experimental import pallas as pl
from jax.experimental.pallas import tpu as pltpu

SEQ_LEN = 6        # self.seq_len = 6 (length of the token input)
INPUT_SIZE = 6     # F.one_hot(..., num_classes=6) == input_size
HIDDEN_SIZE = 32
OUTPUT_SIZE = 16

# Row layout of the packed f32 slab (lanes = 128 = 4*H everywhere).
_ROW_XTAB = 0          # rows 0:8   : per-token xgate rows  W_ih^T[token] + b_ih + b_hh  (6 used)
_ROW_H0 = 8            # row  8     : h0 in lanes 0:H
_ROW_C0 = 9            # row  9     : c0 in lanes 0:H
_ROW_B1 = 10           # row 10     : b1 in lanes 0:H
_ROW_B2 = 11           # row 11     : b2 in lanes 0:O
_ROW_W1 = 16           # rows 16:48 : W1^T (H,H) in lanes 0:H
_ROW_W2 = 48           # rows 48:80 : W2^T (H,O) in lanes 0:O
_FTAB_ROWS = 80


def decoder_kernel(tok_ref, ftab_ref, whh_ref, out_ref, hc_ref):
    T = SEQ_LEN
    H = HIDDEN_SIZE
    O = OUTPUT_SIZE

    # ---- one-time loads from the packed slabs (static slices, off the chain) ----
    whh_t = whh_ref[...]                                       # (H, 4H) bf16
    w1_t = ftab_ref[_ROW_W1:_ROW_W1 + H, 0:H]                  # (H, H)  f32
    w2_t = ftab_ref[_ROW_W2:_ROW_W2 + H, 0:O]                  # (H, O)  f32
    b1 = ftab_ref[_ROW_B1:_ROW_B1 + 1, 0:H]                    # (1, H)  f32
    b2 = ftab_ref[_ROW_B2:_ROW_B2 + 1, 0:O]                    # (1, O)  f32

    # ---- token-indexed xgate rows (W_ih^T[tok] + b_ih + b_hh), loaded up front ----
    # Tokens are clamped to [0, INPUT_SIZE) in the wrapper, so the dynamic row
    # index never leaves the table region of the slab.
    xrows = [ftab_ref[pl.ds(tok_ref[t], 1), :] for t in range(T)]   # each (1, 4H) f32

    h = ftab_ref[_ROW_H0:_ROW_H0 + 1, 0:H]                     # (1, H) f32
    c = ftab_ref[_ROW_C0:_ROW_C0 + 1, 0:H]                     # (1, H) f32

    # ---- fully unrolled recurrence (T = 6, static); only h @ W_hh^T is serial ----
    for t in range(T):
        gates = xrows[t] + jnp.dot(h.astype(jnp.bfloat16), whh_t,
                                   preferred_element_type=jnp.float32)   # (1, 4H) f32

        # full-vreg transcendentals (one sigmoid + one tanh over all 128 lanes),
        # gate order i, f, g, o as in PyTorch nn.LSTM
        s_all = jax.nn.sigmoid(gates)
        t_all = jnp.tanh(gates)
        i_g = s_all[:, 0 * H:1 * H]
        f_g = s_all[:, 1 * H:2 * H]
        g_g = t_all[:, 2 * H:3 * H]
        o_g = s_all[:, 3 * H:4 * H]

        c = f_g * c + i_g * g_g
        h = o_g * jnp.tanh(c)

        # ---- MLP head for step t: not on the recurrence chain, so the scheduler
        #      hides it under steps t+1..T-1; log-softmax is per-row so it can be
        #      finished (and stored) here as well.
        z1 = jnp.maximum(
            jnp.dot(h, w1_t, preferred_element_type=jnp.float32) + b1, 0.0)   # (1, H)
        z2 = jax.nn.sigmoid(
            jnp.dot(z1, w2_t, preferred_element_type=jnp.float32) + b2)       # (1, O)
        m = jnp.max(z2, axis=-1, keepdims=True)
        lse = m + jnp.log(jnp.sum(jnp.exp(z2 - m), axis=-1, keepdims=True))
        out_ref[t:t + 1, :] = z2 - lse

    hc_ref[0:1, :] = h
    hc_ref[1:2, :] = c


def init_params(key):
    """Deterministic parameter init matching the PyTorch module's shapes."""
    H, IN, O = HIDDEN_SIZE, INPUT_SIZE, OUTPUT_SIZE
    ks = jax.random.split(key, 8)
    bound = 1.0 / jnp.sqrt(H)
    u = lambda k, shape: jax.random.uniform(k, shape, jnp.float32, -bound, bound)
    return dict(
        w_ih=u(ks[0], (4 * H, IN)),   # nn.LSTM weight_ih_l0
        w_hh=u(ks[1], (4 * H, H)),    # nn.LSTM weight_hh_l0
        b_ih=u(ks[2], (4 * H,)),
        b_hh=u(ks[3], (4 * H,)),
        w1=u(ks[4], (H, H)),          # out_11
        b1=u(ks[5], (H,)),
        w2=u(ks[6], (O, H)),          # out_12
        b2=u(ks[7], (O,)),
    )


@jax.jit
def decoder_forward(tokens, hn, cn, params):
    """tokens: (T,) int; hn, cn: (1, 1, H) like the PyTorch module."""
    T, H, O, IN = SEQ_LEN, HIDDEN_SIZE, OUTPUT_SIZE, INPUT_SIZE

    # ---- pack inputs into 3 slabs (prologue-DMA reduction) ----
    # f32 slab: per-token xgate-row table (bias folded in), h0, c0, b1, b2, W1^T, W2^T
    xrow_tab = params["w_ih"].T.astype(jnp.float32) \
        + (params["b_ih"] + params["b_hh"])[None, :]                  # (IN, 4H)
    ftab = jnp.zeros((_FTAB_ROWS, 4 * H), jnp.float32)
    ftab = ftab.at[_ROW_XTAB:_ROW_XTAB + IN, :].set(xrow_tab)
    ftab = ftab.at[_ROW_H0, 0:H].set(hn.reshape(H).astype(jnp.float32))
    ftab = ftab.at[_ROW_C0, 0:H].set(cn.reshape(H).astype(jnp.float32))
    ftab = ftab.at[_ROW_B1, 0:H].set(params["b1"])
    ftab = ftab.at[_ROW_B2, 0:O].set(params["b2"])
    ftab = ftab.at[_ROW_W1:_ROW_W1 + H, 0:H].set(params["w1"].T)
    ftab = ftab.at[_ROW_W2:_ROW_W2 + H, 0:O].set(params["w2"].T)

    # bf16 only on the recurrent path (the one cast that buys per-step latency)
    whh_t = params["w_hh"].T.astype(jnp.bfloat16)                     # (H, 4H)

    # F.one_hot would raise on out-of-range tokens; clamp so the in-kernel
    # dynamic row load stays inside the table region.
    tok = jnp.clip(tokens.astype(jnp.int32), 0, IN - 1)               # (T,)

    smem = pl.BlockSpec(memory_space=pltpu.MemorySpace.SMEM)
    vmem = pl.BlockSpec(memory_space=pltpu.MemorySpace.VMEM)

    out, hc = pl.pallas_call(
        decoder_kernel,
        out_shape=(
            jax.ShapeDtypeStruct((T, O), jnp.float32),
            jax.ShapeDtypeStruct((2, H), jnp.float32),
        ),
        in_specs=[smem, vmem, vmem],
        out_specs=(vmem, vmem),
    )(tok, ftab, whh_t)

    # PyTorch returns (output, (h_n, c_n)) with h/c of shape (n_layers, batch, H)
    return out, (hc[0:1].reshape(1, 1, H), hc[1:2].reshape(1, 1, H))


def decoder_reference(tokens, hn, cn, params):
    """Pure-JAX reference mirroring the kernel's numerics (bf16 only on W_hh/h)."""
    T, H, O = SEQ_LEN, HIDDEN_SIZE, OUTPUT_SIZE
    whh_t = params["w_hh"].T.astype(jnp.bfloat16)
    xtab = params["w_ih"].T.astype(jnp.float32) \
        + (params["b_ih"] + params["b_hh"])[None, :]
    h = hn.reshape(1, H).astype(jnp.float32)
    c = cn.reshape(1, H).astype(jnp.float32)
    outs = []
    for t in range(T):
        gates = xtab[tokens[t]][None, :] + jnp.dot(
            h.astype(jnp.bfloat16), whh_t, preferred_element_type=jnp.float32)
        i_g = jax.nn.sigmoid(gates[:, 0 * H:1 * H])
        f_g = jax.nn.sigmoid(gates[:, 1 * H:2 * H])
        g_g = jnp.tanh(gates[:, 2 * H:3 * H])
        o_g = jax.nn.sigmoid(gates[:, 3 * H:4 * H])
        c = f_g * c + i_g * g_g
        h = o_g * jnp.tanh(c)
        z1 = jnp.maximum(h @ params["w1"].T + params["b1"][None, :], 0.0)
        z2 = jax.nn.sigmoid(z1 @ params["w2"].T + params["b2"][None, :])
        outs.append(jax.nn.log_softmax(z2, axis=-1))
    return jnp.concatenate(outs, axis=0), h.reshape(1, 1, H), c.reshape(1, 1, H)


if __name__ == "__main__":
    key = jax.random.PRNGKey(0)
    k_tok, k_par = jax.random.split(key)

    tokens = jax.random.randint(k_tok, (SEQ_LEN,), 0, INPUT_SIZE, dtype=jnp.int32)
    params = init_params(k_par)
    hn0 = jnp.zeros((1, 1, HIDDEN_SIZE), jnp.float32)    # initHidden()
    cn0 = jnp.zeros((1, 1, HIDDEN_SIZE), jnp.float32)

    out, (hn, cn) = decoder_forward(tokens, hn0, cn0, params)
    jax.block_until_ready((out, hn, cn))

    ref_out, ref_h, ref_c = decoder_reference(tokens, hn0, cn0, params)

    assert out.shape == (SEQ_LEN, OUTPUT_SIZE)
    assert hn.shape == (1, 1, HIDDEN_SIZE) and cn.shape == (1, 1, HIDDEN_SIZE)
    assert bool(jnp.all(jnp.isfinite(out)))
    assert bool(jnp.allclose(out, ref_out, atol=2e-3, rtol=2e-3))
    assert bool(jnp.allclose(hn, ref_h, atol=2e-3, rtol=2e-3))
    assert bool(jnp.allclose(cn, ref_c, atol=2e-3, rtol=2e-3))
    print("KERNEL_OK")
</pallas_src>

<mosaic_0001>
module attributes {stable_mosaic.version = 11 : i64} {
  func.func @decoder_kernel(%arg0: memref<6xi32, #tpu.memory_space<smem>>, %arg1: memref<80x128xf32, #tpu.memory_space<vmem>>, %arg2: memref<32x128xbf16, #tpu.memory_space<vmem>>, %arg3: memref<6x16xf32, #tpu.memory_space<vmem>>, %arg4: memref<2x32xf32, #tpu.memory_space<vmem>>) attributes {dimension_semantics = [], scalar_prefetch = 0 : i64, scratch_operands = 0 : i64, tpu.core_type = #tpu.core_type<tc>} {
    %c0 = arith.constant 0 : index
    %c0_0 = arith.constant 0 : index
    %0 = vector.load %arg2[%c0, %c0_0] : memref<32x128xbf16, #tpu.memory_space<vmem>>, vector<32x128xbf16>
    %c16 = arith.constant 16 : index
    %c0_1 = arith.constant 0 : index
    %1 = vector.load %arg1[%c16, %c0_1] : memref<80x128xf32, #tpu.memory_space<vmem>>, vector<32x32xf32>
    %c48 = arith.constant 48 : index
    %c0_2 = arith.constant 0 : index
    %2 = vector.load %arg1[%c48, %c0_2] : memref<80x128xf32, #tpu.memory_space<vmem>>, vector<32x16xf32>
    %c10 = arith.constant 10 : index
    %c0_3 = arith.constant 0 : index
    %3 = vector.load %arg1[%c10, %c0_3] : memref<80x128xf32, #tpu.memory_space<vmem>>, vector<1x32xf32>
    %c11 = arith.constant 11 : index
    %c0_4 = arith.constant 0 : index
    %4 = vector.load %arg1[%c11, %c0_4] : memref<80x128xf32, #tpu.memory_space<vmem>>, vector<1x16xf32>
    %c0_5 = arith.constant 0 : index
    %5 = memref.load %arg0[%c0_5] : memref<6xi32, #tpu.memory_space<smem>>
    %6 = arith.index_cast %5 : i32 to index
    %c0_6 = arith.constant 0 : index
    %7 = vector.load %arg1[%6, %c0_6] : memref<80x128xf32, #tpu.memory_space<vmem>>, vector<1x128xf32>
    %c1 = arith.constant 1 : index
    %8 = memref.load %arg0[%c1] : memref<6xi32, #tpu.memory_space<smem>>
    %9 = arith.index_cast %8 : i32 to index
    %c0_7 = arith.constant 0 : index
    %10 = vector.load %arg1[%9, %c0_7] : memref<80x128xf32, #tpu.memory_space<vmem>>, vector<1x128xf32>
    %c2 = arith.constant 2 : index
    %11 = memref.load %arg0[%c2] : memref<6xi32, #tpu.memory_space<smem>>
    %12 = arith.index_cast %11 : i32 to index
    %c0_8 = arith.constant 0 : index
    %13 = vector.load %arg1[%12, %c0_8] : memref<80x128xf32, #tpu.memory_space<vmem>>, vector<1x128xf32>
    %c3 = arith.constant 3 : index
    %14 = memref.load %arg0[%c3] : memref<6xi32, #tpu.memory_space<smem>>
    %15 = arith.index_cast %14 : i32 to index
    %c0_9 = arith.constant 0 : index
    %16 = vector.load %arg1[%15, %c0_9] : memref<80x128xf32, #tpu.memory_space<vmem>>, vector<1x128xf32>
    %c4 = arith.constant 4 : index
    %17 = memref.load %arg0[%c4] : memref<6xi32, #tpu.memory_space<smem>>
    %18 = arith.index_cast %17 : i32 to index
    %c0_10 = arith.constant 0 : index
    %19 = vector.load %arg1[%18, %c0_10] : memref<80x128xf32, #tpu.memory_space<vmem>>, vector<1x128xf32>
    %c5 = arith.constant 5 : index
    %20 = memref.load %arg0[%c5] : memref<6xi32, #tpu.memory_space<smem>>
    %21 = arith.index_cast %20 : i32 to index
    %c0_11 = arith.constant 0 : index
    %22 = vector.load %arg1[%21, %c0_11] : memref<80x128xf32, #tpu.memory_space<vmem>>, vector<1x128xf32>
    %c8 = arith.constant 8 : index
    %c0_12 = arith.constant 0 : index
    %23 = vector.load %arg1[%c8, %c0_12] : memref<80x128xf32, #tpu.memory_space<vmem>>, vector<1x32xf32>
    %c9 = arith.constant 9 : index
    %c0_13 = arith.constant 0 : index
    %24 = vector.load %arg1[%c9, %c0_13] : memref<80x128xf32, #tpu.memory_space<vmem>>, vector<1x32xf32>
    %25 = arith.truncf %23 : vector<1x32xf32> to vector<1x32xbf16>
    %cst = arith.constant dense<0.000000e+00> : vector<1x128xf32>
    %26 = tpu.matmul %25, %0, %cst {dimension_numbers = #tpu.dot_dimension_numbers<[1], [0], [0], [1], [0, 0, 1, 1], [], []>} : vector<1x32xbf16>, vector<32x128xbf16>, vector<1x128xf32> -> vector<1x128xf32>
    %27 = arith.addf %7, %26 : vector<1x128xf32>
    %28 = arith.negf %27 : vector<1x128xf32>
    %29 = math.exp %28 : vector<1x128xf32>
    %cst_14 = arith.constant 1.000000e+00 : f32
    %30 = vector.broadcast %cst_14 : f32 to vector<1x128xf32>
    %31 = arith.addf %30, %29 : vector<1x128xf32>
    %32 = arith.divf %30, %31 : vector<1x128xf32>
    %33 = math.tanh %27 : vector<1x128xf32>
    %34 = vector.extract_strided_slice %32 {offsets = [0, 0], sizes = [1, 32], strides = [1, 1]} : vector<1x128xf32> to vector<1x32xf32>
    %35 = vector.extract_strided_slice %32 {offsets = [0, 32], sizes = [1, 32], strides = [1, 1]} : vector<1x128xf32> to vector<1x32xf32>
    %36 = vector.extract_strided_slice %33 {offsets = [0, 64], sizes = [1, 32], strides = [1, 1]} : vector<1x128xf32> to vector<1x32xf32>
    %37 = vector.extract_strided_slice %32 {offsets = [0, 96], sizes = [1, 32], strides = [1, 1]} : vector<1x128xf32> to vector<1x32xf32>
    %38 = arith.mulf %35, %24 : vector<1x32xf32>
    %39 = arith.mulf %34, %36 : vector<1x32xf32>
    %40 = arith.addf %38, %39 : vector<1x32xf32>
    %41 = math.tanh %40 : vector<1x32xf32>
    %42 = arith.mulf %37, %41 : vector<1x32xf32>
    %cst_15 = arith.constant dense<0.000000e+00> : vector<1x32xf32>
    %43 = tpu.matmul %42, %1, %cst_15 {dimension_numbers = #tpu.dot_dimension_numbers<[1], [0], [0], [1], [0, 0, 1, 1], [], []>} : vector<1x32xf32>, vector<32x32xf32>, vector<1x32xf32> -> vector<1x32xf32>
    %44 = arith.addf %43, %3 : vector<1x32xf32>
    %cst_16 = arith.constant 0.000000e+00 : f32
    %45 = vector.broadcast %cst_16 : f32 to vector<1x32xf32>
    %46 = arith.maximumf %44, %45 : vector<1x32xf32>
    %cst_17 = arith.constant dense<0.000000e+00> : vector<1x16xf32>
    %47 = tpu.matmul %46, %2, %cst_17 {dimension_numbers = #tpu.dot_dimension_numbers<[1], [0], [0], [1], [0, 0, 1, 1], [], []>} : vector<1x32xf32>, vector<32x16xf32>, vector<1x16xf32> -> vector<1x16xf32>
    %48 = arith.addf %47, %4 : vector<1x16xf32>
    %49 = arith.negf %48 : vector<1x16xf32>
    %50 = math.exp %49 : vector<1x16xf32>
    %cst_18 = arith.constant 1.000000e+00 : f32
    %51 = vector.broadcast %cst_18 : f32 to vector<1x16xf32>
    %52 = arith.addf %51, %50 : vector<1x16xf32>
    %53 = arith.divf %51, %52 : vector<1x16xf32>
    %cst_19 = arith.constant dense<0xFF800000> : vector<1xf32>
    %54 = vector.multi_reduction <maximumf>, %53, %cst_19 [1] : vector<1x16xf32> to vector<1xf32>
    %55 = vector.shape_cast %54 : vector<1xf32> to vector<1x1xf32>
    %56 = vector.broadcast %55 : vector<1x1xf32> to vector<1x16xf32>
    %57 = arith.subf %53, %56 : vector<1x16xf32>
    %58 = math.exp %57 : vector<1x16xf32>
    %cst_20 = arith.constant dense<0.000000e+00> : vector<1xf32>
    %59 = vector.multi_reduction <add>, %58, %cst_20 [1] : vector<1x16xf32> to vector<1xf32>
    %60 = vector.shape_cast %59 : vector<1xf32> to vector<1x1xf32>
    %61 = math.log %60 : vector<1x1xf32>
    %62 = arith.addf %55, %61 : vector<1x1xf32>
    %63 = vector.broadcast %62 : vector<1x1xf32> to vector<1x16xf32>
    %64 = arith.subf %53, %63 : vector<1x16xf32>
    %c0_21 = arith.constant 0 : index
    %c0_22 = arith.constant 0 : index
    %65 = vector.load %arg3[%c0_21, %c0_22] : memref<6x16xf32, #tpu.memory_space<vmem>>, vector<1x16xf32>
    tpu.vector_store %arg3[%c0_21, %c0_22], %64 {strides = array<i32>} : memref<6x16xf32, #tpu.memory_space<vmem>>, vector<1x16xf32>,
    %66 = arith.truncf %42 : vector<1x32xf32> to vector<1x32xbf16>
    %cst_23 = arith.constant dense<0.000000e+00> : vector<1x128xf32>
    %67 = tpu.matmul %66, %0, %cst_23 {dimension_numbers = #tpu.dot_dimension_numbers<[1], [0], [0], [1], [0, 0, 1, 1], [], []>} : vector<1x32xbf16>, vector<32x128xbf16>, vector<1x128xf32> -> vector<1x128xf32>
    %68 = arith.addf %10, %67 : vector<1x128xf32>
    %69 = arith.negf %68 : vector<1x128xf32>
    %70 = math.exp %69 : vector<1x128xf32>
    %cst_24 = arith.constant 1.000000e+00 : f32
    %71 = vector.broadcast %cst_24 : f32 to vector<1x128xf32>
    %72 = arith.addf %71, %70 : vector<1x128xf32>
    %73 = arith.divf %71, %72 : vector<1x128xf32>
    %74 = math.tanh %68 : vector<1x128xf32>
    %75 = vector.extract_strided_slice %73 {offsets = [0, 0], sizes = [1, 32], strides = [1, 1]} : vector<1x128xf32> to vector<1x32xf32>
    %76 = vector.extract_strided_slice %73 {offsets = [0, 32], sizes = [1, 32], strides = [1, 1]} : vector<1x128xf32> to vector<1x32xf32>
    %77 = vector.extract_strided_slice %74 {offsets = [0, 64], sizes = [1, 32], strides = [1, 1]} : vector<1x128xf32> to vector<1x32xf32>
    %78 = vector.extract_strided_slice %73 {offsets = [0, 96], sizes = [1, 32], strides = [1, 1]} : vector<1x128xf32> to vector<1x32xf32>
    %79 = arith.mulf %76, %40 : vector<1x32xf32>
    %80 = arith.mulf %75, %77 : vector<1x32xf32>
    %81 = arith.addf %79, %80 : vector<1x32xf32>
    %82 = math.tanh %81 : vector<1x32xf32>
    %83 = arith.mulf %78, %82 : vector<1x32xf32>
    %cst_25 = arith.constant dense<0.000000e+00> : vector<1x32xf32>
    %84 = tpu.matmul %83, %1, %cst_25 {dimension_numbers = #tpu.dot_dimension_numbers<[1], [0], [0], [1], [0, 0, 1, 1], [], []>} : vector<1x32xf32>, vector<32x32xf32>, vector<1x32xf32> -> vector<1x32xf32>
    %85 = arith.addf %84, %3 : vector<1x32xf32>
    %cst_26 = arith.constant 0.000000e+00 : f32
    %86 = vector.broadcast %cst_26 : f32 to vector<1x32xf32>
    %87 = arith.maximumf %85, %86 : vector<1x32xf32>
    %cst_27 = arith.constant dense<0.000000e+00> : vector<1x16xf32>
    %88 = tpu.matmul %87, %2, %cst_27 {dimension_numbers = #tpu.dot_dimension_numbers<[1], [0], [0], [1], [0, 0, 1, 1], [], []>} : vector<1x32xf32>, vector<32x16xf32>, vector<1x16xf32> -> vector<1x16xf32>
    %89 = arith.addf %88, %4 : vector<1x16xf32>
    %90 = arith.negf %89 : vector<1x16xf32>
    %91 = math.exp %90 : vector<1x16xf32>
    %cst_28 = arith.constant 1.000000e+00 : f32
    %92 = vector.broadcast %cst_28 : f32 to vector<1x16xf32>
    %93 = arith.addf %92, %91 : vector<1x16xf32>
    %94 = arith.divf %92, %93 : vector<1x16xf32>
    %cst_29 = arith.constant dense<0xFF800000> : vector<1xf32>
    %95 = vector.multi_reduction <maximumf>, %94, %cst_29 [1] : vector<1x16xf32> to vector<1xf32>
    %96 = vector.shape_cast %95 : vector<1xf32> to vector<1x1xf32>
    %97 = vector.broadcast %96 : vector<1x1xf32> to vector<1x16xf32>
    %98 = arith.subf %94, %97 : vector<1x16xf32>
    %99 = math.exp %98 : vector<1x16xf32>
    %cst_30 = arith.constant dense<0.000000e+00> : vector<1xf32>
    %100 = vector.multi_reduction <add>, %99, %cst_30 [1] : vector<1x16xf32> to vector<1xf32>
    %101 = vector.shape_cast %100 : vector<1xf32> to vector<1x1xf32>
    %102 = math.log %101 : vector<1x1xf32>
    %103 = arith.addf %96, %102 : vector<1x1xf32>
    %104 = vector.broadcast %103 : vector<1x1xf32> to vector<1x16xf32>
    %105 = arith.subf %94, %104 : vector<1x16xf32>
    %c1_31 = arith.constant 1 : index
    %c0_32 = arith.constant 0 : index
    %106 = vector.load %arg3[%c1_31, %c0_32] : memref<6x16xf32, #tpu.memory_space<vmem>>, vector<1x16xf32>
    tpu.vector_store %arg3[%c1_31, %c0_32], %105 {strides = array<i32>} : memref<6x16xf32, #tpu.memory_space<vmem>>, vector<1x16xf32>,
    %107 = arith.truncf %83 : vector<1x32xf32> to vector<1x32xbf16>
    %cst_33 = arith.constant dense<0.000000e+00> : vector<1x128xf32>
    %108 = tpu.matmul %107, %0, %cst_33 {dimension_numbers = #tpu.dot_dimension_numbers<[1], [0], [0], [1], [0, 0, 1, 1], [], []>} : vector<1x32xbf16>, vector<32x128xbf16>, vector<1x128xf32> -> vector<1x128xf32>
    %109 = arith.addf %13, %108 : vector<1x128xf32>
    %110 = arith.negf %109 : vector<1x128xf32>
    %111 = math.exp %110 : vector<1x128xf32>
    %cst_34 = arith.constant 1.000000e+00 : f32
    %112 = vector.broadcast %cst_34 : f32 to vector<1x128xf32>
    %113 = arith.addf %112, %111 : vector<1x128xf32>
    %114 = arith.divf %112, %113 : vector<1x128xf32>
    %115 = math.tanh %109 : vector<1x128xf32>
    %116 = vector.extract_strided_slice %114 {offsets = [0, 0], sizes = [1, 32], strides = [1, 1]} : vector<1x128xf32> to vector<1x32xf32>
    %117 = vector.extract_strided_slice %114 {offsets = [0, 32], sizes = [1, 32], strides = [1, 1]} : vector<1x128xf32> to vector<1x32xf32>
    %118 = vector.extract_strided_slice %115 {offsets = [0, 64], sizes = [1, 32], strides = [1, 1]} : vector<1x128xf32> to vector<1x32xf32>
    %119 = vector.extract_strided_slice %114 {offsets = [0, 96], sizes = [1, 32], strides = [1, 1]} : vector<1x128xf32> to vector<1x32xf32>
    %120 = arith.mulf %117, %81 : vector<1x32xf32>
    %121 = arith.mulf %116, %118 : vector<1x32xf32>
    %122 = arith.addf %120, %121 : vector<1x32xf32>
    %123 = math.tanh %122 : vector<1x32xf32>
    %124 = arith.mulf %119, %123 : vector<1x32xf32>
    %cst_35 = arith.constant dense<0.000000e+00> : vector<1x32xf32>
    %125 = tpu.matmul %124, %1, %cst_35 {dimension_numbers = #tpu.dot_dimension_numbers<[1], [0], [0], [1], [0, 0, 1, 1], [], []>} : vector<1x32xf32>, vector<32x32xf32>, vector<1x32xf32> -> vector<1x32xf32>
    %126 = arith.addf %125, %3 : vector<1x32xf32>
    %cst_36 = arith.constant 0.000000e+00 : f32
    %127 = vector.broadcast %cst_36 : f32 to vector<1x32xf32>
    %128 = arith.maximumf %126, %127 : vector<1x32xf32>
    %cst_37 = arith.constant dense<0.000000e+00> : vector<1x16xf32>
    %129 = tpu.matmul %128, %2, %cst_37 {dimension_numbers = #tpu.dot_dimension_numbers<[1], [0], [0], [1], [0, 0, 1, 1], [], []>} : vector<1x32xf32>, vector<32x16xf32>, vector<1x16xf32> -> vector<1x16xf32>
    %130 = arith.addf %129, %4 : vector<1x16xf32>
    %131 = arith.negf %130 : vector<1x16xf32>
    %132 = math.exp %131 : vector<1x16xf32>
    %cst_38 = arith.constant 1.000000e+00 : f32
    %133 = vector.broadcast %cst_38 : f32 to vector<1x16xf32>
    %134 = arith.addf %133, %132 : vector<1x16xf32>
    %135 = arith.divf %133, %134 : vector<1x16xf32>
    %cst_39 = arith.constant dense<0xFF800000> : vector<1xf32>
    %136 = vector.multi_reduction <maximumf>, %135, %cst_39 [1] : vector<1x16xf32> to vector<1xf32>
    %137 = vector.shape_cast %136 : vector<1xf32> to vector<1x1xf32>
    %138 = vector.broadcast %137 : vector<1x1xf32> to vector<1x16xf32>
    %139 = arith.subf %135, %138 : vector<1x16xf32>
    %140 = math.exp %139 : vector<1x16xf32>
    %cst_40 = arith.constant dense<0.000000e+00> : vector<1xf32>
    %141 = vector.multi_reduction <add>, %140, %cst_40 [1] : vector<1x16xf32> to vector<1xf32>
    %142 = vector.shape_cast %141 : vector<1xf32> to vector<1x1xf32>
    %143 = math.log %142 : vector<1x1xf32>
    %144 = arith.addf %137, %143 : vector<1x1xf32>
    %145 = vector.broadcast %144 : vector<1x1xf32> to vector<1x16xf32>
    %146 = arith.subf %135, %145 : vector<1x16xf32>
    %c2_41 = arith.constant 2 : index
    %c0_42 = arith.constant 0 : index
    %147 = vector.load %arg3[%c2_41, %c0_42] : memref<6x16xf32, #tpu.memory_space<vmem>>, vector<1x16xf32>
    tpu.vector_store %arg3[%c2_41, %c0_42], %146 {strides = array<i32>} : memref<6x16xf32, #tpu.memory_space<vmem>>, vector<1x16xf32>,
    %148 = arith.truncf %124 : vector<1x32xf32> to vector<1x32xbf16>
    %cst_43 = arith.constant dense<0.000000e+00> : vector<1x128xf32>
    %149 = tpu.matmul %148, %0, %cst_43 {dimension_numbers = #tpu.dot_dimension_numbers<[1], [0], [0], [1], [0, 0, 1, 1], [], []>} : vector<1x32xbf16>, vector<32x128xbf16>, vector<1x128xf32> -> vector<1x128xf32>
    %150 = arith.addf %16, %149 : vector<1x128xf32>
    %151 = arith.negf %150 : vector<1x128xf32>
    %152 = math.exp %151 : vector<1x128xf32>
    %cst_44 = arith.constant 1.000000e+00 : f32
    %153 = vector.broadcast %cst_44 : f32 to vector<1x128xf32>
    %154 = arith.addf %153, %152 : vector<1x128xf32>
    %155 = arith.divf %153, %154 : vector<1x128xf32>
    %156 = math.tanh %150 : vector<1x128xf32>
    %157 = vector.extract_strided_slice %155 {offsets = [0, 0], sizes = [1, 32], strides = [1, 1]} : vector<1x128xf32> to vector<1x32xf32>
    %158 = vector.extract_strided_slice %155 {offsets = [0, 32], sizes = [1, 32], strides = [1, 1]} : vector<1x128xf32> to vector<1x32xf32>
    %159 = vector.extract_strided_slice %156 {offsets = [0, 64], sizes = [1, 32], strides = [1, 1]} : vector<1x128xf32> to vector<1x32xf32>
    %160 = vector.extract_strided_slice %155 {offsets = [0, 96], sizes = [1, 32], strides = [1, 1]} : vector<1x128xf32> to vector<1x32xf32>
    %161 = arith.mulf %158, %122 : vector<1x32xf32>
    %162 = arith.mulf %157, %159 : vector<1x32xf32>
    %163 = arith.addf %161, %162 : vector<1x32xf32>
    %164 = math.tanh %163 : vector<1x32xf32>
    %165 = arith.mulf %160, %164 : vector<1x32xf32>
    %cst_45 = arith.constant dense<0.000000e+00> : vector<1x32xf32>
    %166 = tpu.matmul %165, %1, %cst_45 {dimension_numbers = #tpu.dot_dimension_numbers<[1], [0], [0], [1], [0, 0, 1, 1], [], []>} : vector<1x32xf32>, vector<32x32xf32>, vector<1x32xf32> -> vector<1x32xf32>
    %167 = arith.addf %166, %3 : vector<1x32xf32>
    %cst_46 = arith.constant 0.000000e+00 : f32
    %168 = vector.broadcast %cst_46 : f32 to vector<1x32xf32>
    %169 = arith.maximumf %167, %168 : vector<1x32xf32>
    %cst_47 = arith.constant dense<0.000000e+00> : vector<1x16xf32>
    %170 = tpu.matmul %169, %2, %cst_47 {dimension_numbers = #tpu.dot_dimension_numbers<[1], [0], [0], [1], [0, 0, 1, 1], [], []>} : vector<1x32xf32>, vector<32x16xf32>, vector<1x16xf32> -> vector<1x16xf32>
    %171 = arith.addf %170, %4 : vector<1x16xf32>
    %172 = arith.negf %171 : vector<1x16xf32>
    %173 = math.exp %172 : vector<1x16xf32>
    %cst_48 = arith.constant 1.000000e+00 : f32
    %174 = vector.broadcast %cst_48 : f32 to vector<1x16xf32>
    %175 = arith.addf %174, %173 : vector<1x16xf32>
    %176 = arith.divf %174, %175 : vector<1x16xf32>
    %cst_49 = arith.constant dense<0xFF800000> : vector<1xf32>
    %177 = vector.multi_reduction <maximumf>, %176, %cst_49 [1] : vector<1x16xf32> to vector<1xf32>
    %178 = vector.shape_cast %177 : vector<1xf32> to vector<1x1xf32>
    %179 = vector.broadcast %178 : vector<1x1xf32> to vector<1x16xf32>
    %180 = arith.subf %176, %179 : vector<1x16xf32>
    %181 = math.exp %180 : vector<1x16xf32>
    %cst_50 = arith.constant dense<0.000000e+00> : vector<1xf32>
    %182 = vector.multi_reduction <add>, %181, %cst_50 [1] : vector<1x16xf32> to vector<1xf32>
    %183 = vector.shape_cast %182 : vector<1xf32> to vector<1x1xf32>
    %184 = math.log %183 : vector<1x1xf32>
    %185 = arith.addf %178, %184 : vector<1x1xf32>
    %186 = vector.broadcast %185 : vector<1x1xf32> to vector<1x16xf32>
    %187 = arith.subf %176, %186 : vector<1x16xf32>
    %c3_51 = arith.constant 3 : index
    %c0_52 = arith.constant 0 : index
    %188 = vector.load %arg3[%c3_51, %c0_52] : memref<6x16xf32, #tpu.memory_space<vmem>>, vector<1x16xf32>
    tpu.vector_store %arg3[%c3_51, %c0_52], %187 {strides = array<i32>} : memref<6x16xf32, #tpu.memory_space<vmem>>, vector<1x16xf32>,
    %189 = arith.truncf %165 : vector<1x32xf32> to vector<1x32xbf16>
    %cst_53 = arith.constant dense<0.000000e+00> : vector<1x128xf32>
    %190 = tpu.matmul %189, %0, %cst_53 {dimension_numbers = #tpu.dot_dimension_numbers<[1], [0], [0], [1], [0, 0, 1, 1], [], []>} : vector<1x32xbf16>, vector<32x128xbf16>, vector<1x128xf32> -> vector<1x128xf32>
    %191 = arith.addf %19, %190 : vector<1x128xf32>
    %192 = arith.negf %191 : vector<1x128xf32>
    %193 = math.exp %192 : vector<1x128xf32>
    %cst_54 = arith.constant 1.000000e+00 : f32
    %194 = vector.broadcast %cst_54 : f32 to vector<1x128xf32>
    %195 = arith.addf %194, %193 : vector<1x128xf32>
    %196 = arith.divf %194, %195 : vector<1x128xf32>
    %197 = math.tanh %191 : vector<1x128xf32>
    %198 = vector.extract_strided_slice %196 {offsets = [0, 0], sizes = [1, 32], strides = [1, 1]} : vector<1x128xf32> to vector<1x32xf32>
    %199 = vector.extract_strided_slice %196 {offsets = [0, 32], sizes = [1, 32], strides = [1, 1]} : vector<1x128xf32> to vector<1x32xf32>
    %200 = vector.extract_strided_slice %197 {offsets = [0, 64], sizes = [1, 32], strides = [1, 1]} : vector<1x128xf32> to vector<1x32xf32>
    %201 = vector.extract_strided_slice %196 {offsets = [0, 96], sizes = [1, 32], strides = [1, 1]} : vector<1x128xf32> to vector<1x32xf32>
    %202 = arith.mulf %199, %163 : vector<1x32xf32>
    %203 = arith.mulf %198, %200 : vector<1x32xf32>
    %204 = arith.addf %202, %203 : vector<1x32xf32>
    %205 = math.tanh %204 : vector<1x32xf32>
    %206 = arith.mulf %201, %205 : vector<1x32xf32>
    %cst_55 = arith.constant dense<0.000000e+00> : vector<1x32xf32>
    %207 = tpu.matmul %206, %1, %cst_55 {dimension_numbers = #tpu.dot_dimension_numbers<[1], [0], [0], [1], [0, 0, 1, 1], [], []>} : vector<1x32xf32>, vector<32x32xf32>, vector<1x32xf32> -> vector<1x32xf32>
    %208 = arith.addf %207, %3 : vector<1x32xf32>
    %cst_56 = arith.constant 0.000000e+00 : f32
    %209 = vector.broadcast %cst_56 : f32 to vector<1x32xf32>
    %210 = arith.maximumf %208, %209 : vector<1x32xf32>
    %cst_57 = arith.constant dense<0.000000e+00> : vector<1x16xf32>
    %211 = tpu.matmul %210, %2, %cst_57 {dimension_numbers = #tpu.dot_dimension_numbers<[1], [0], [0], [1], [0, 0, 1, 1], [], []>} : vector<1x32xf32>, vector<32x16xf32>, vector<1x16xf32> -> vector<1x16xf32>
    %212 = arith.addf %211, %4 : vector<1x16xf32>
    %213 = arith.negf %212 : vector<1x16xf32>
    %214 = math.exp %213 : vector<1x16xf32>
    %cst_58 = arith.constant 1.000000e+00 : f32
    %215 = vector.broadcast %cst_58 : f32 to vector<1x16xf32>
    %216 = arith.addf %215, %214 : vector<1x16xf32>
    %217 = arith.divf %215, %216 : vector<1x16xf32>
    %cst_59 = arith.constant dense<0xFF800000> : vector<1xf32>
    %218 = vector.multi_reduction <maximumf>, %217, %cst_59 [1] : vector<1x16xf32> to vector<1xf32>
    %219 = vector.shape_cast %218 : vector<1xf32> to vector<1x1xf32>
    %220 = vector.broadcast %219 : vector<1x1xf32> to vector<1x16xf32>
    %221 = arith.subf %217, %220 : vector<1x16xf32>
    %222 = math.exp %221 : vector<1x16xf32>
    %cst_60 = arith.constant dense<0.000000e+00> : vector<1xf32>
    %223 = vector.multi_reduction <add>, %222, %cst_60 [1] : vector<1x16xf32> to vector<1xf32>
    %224 = vector.shape_cast %223 : vector<1xf32> to vector<1x1xf32>
    %225 = math.log %224 : vector<1x1xf32>
    %226 = arith.addf %219, %225 : vector<1x1xf32>
    %227 = vector.broadcast %226 : vector<1x1xf32> to vector<1x16xf32>
    %228 = arith.subf %217, %227 : vector<1x16xf32>
    %c4_61 = arith.constant 4 : index
    %c0_62 = arith.constant 0 : index
    %229 = vector.load %arg3[%c4_61, %c0_62] : memref<6x16xf32, #tpu.memory_space<vmem>>, vector<1x16xf32>
    tpu.vector_store %arg3[%c4_61, %c0_62], %228 {strides = array<i32>} : memref<6x16xf32, #tpu.memory_space<vmem>>, vector<1x16xf32>,
    %230 = arith.truncf %206 : vector<1x32xf32> to vector<1x32xbf16>
    %cst_63 = arith.constant dense<0.000000e+00> : vector<1x128xf32>
    %231 = tpu.matmul %230, %0, %cst_63 {dimension_numbers = #tpu.dot_dimension_numbers<[1], [0], [0], [1], [0, 0, 1, 1], [], []>} : vector<1x32xbf16>, vector<32x128xbf16>, vector<1x128xf32> -> vector<1x128xf32>
    %232 = arith.addf %22, %231 : vector<1x128xf32>
    %233 = arith.negf %232 : vector<1x128xf32>
    %234 = math.exp %233 : vector<1x128xf32>
    %cst_64 = arith.constant 1.000000e+00 : f32
    %235 = vector.broadcast %cst_64 : f32 to vector<1x128xf32>
    %236 = arith.addf %235, %234 : vector<1x128xf32>
    %237 = arith.divf %235, %236 : vector<1x128xf32>
    %238 = math.tanh %232 : vector<1x128xf32>
    %239 = vector.extract_strided_slice %237 {offsets = [0, 0], sizes = [1, 32], strides = [1, 1]} : vector<1x128xf32> to vector<1x32xf32>
    %240 = vector.extract_strided_slice %237 {offsets = [0, 32], sizes = [1, 32], strides = [1, 1]} : vector<1x128xf32> to vector<1x32xf32>
    %241 = vector.extract_strided_slice %238 {offsets = [0, 64], sizes = [1, 32], strides = [1, 1]} : vector<1x128xf32> to vector<1x32xf32>
    %242 = vector.extract_strided_slice %237 {offsets = [0, 96], sizes = [1, 32], strides = [1, 1]} : vector<1x128xf32> to vector<1x32xf32>
    %243 = arith.mulf %240, %204 : vector<1x32xf32>
    %244 = arith.mulf %239, %241 : vector<1x32xf32>
    %245 = arith.addf %243, %244 : vector<1x32xf32>
    %246 = math.tanh %245 : vector<1x32xf32>
    %247 = arith.mulf %242, %246 : vector<1x32xf32>
    %cst_65 = arith.constant dense<0.000000e+00> : vector<1x32xf32>
    %248 = tpu.matmul %247, %1, %cst_65 {dimension_numbers = #tpu.dot_dimension_numbers<[1], [0], [0], [1], [0, 0, 1, 1], [], []>} : vector<1x32xf32>, vector<32x32xf32>, vector<1x32xf32> -> vector<1x32xf32>
    %249 = arith.addf %248, %3 : vector<1x32xf32>
    %cst_66 = arith.constant 0.000000e+00 : f32
    %250 = vector.broadcast %cst_66 : f32 to vector<1x32xf32>
    %251 = arith.maximumf %249, %250 : vector<1x32xf32>
    %cst_67 = arith.constant dense<0.000000e+00> : vector<1x16xf32>
    %252 = tpu.matmul %251, %2, %cst_67 {dimension_numbers = #tpu.dot_dimension_numbers<[1], [0], [0], [1], [0, 0, 1, 1], [], []>} : vector<1x32xf32>, vector<32x16xf32>, vector<1x16xf32> -> vector<1x16xf32>
    %253 = arith.addf %252, %4 : vector<1x16xf32>
    %254 = arith.negf %253 : vector<1x16xf32>
    %255 = math.exp %254 : vector<1x16xf32>
    %cst_68 = arith.constant 1.000000e+00 : f32
    %256 = vector.broadcast %cst_68 : f32 to vector<1x16xf32>
    %257 = arith.addf %256, %255 : vector<1x16xf32>
    %258 = arith.divf %256, %257 : vector<1x16xf32>
    %cst_69 = arith.constant dense<0xFF800000> : vector<1xf32>
    %259 = vector.multi_reduction <maximumf>, %258, %cst_69 [1] : vector<1x16xf32> to vector<1xf32>
    %260 = vector.shape_cast %259 : vector<1xf32> to vector<1x1xf32>
    %261 = vector.broadcast %260 : vector<1x1xf32> to vector<1x16xf32>
    %262 = arith.subf %258, %261 : vector<1x16xf32>
    %263 = math.exp %262 : vector<1x16xf32>
    %cst_70 = arith.constant dense<0.000000e+00> : vector<1xf32>
    %264 = vector.multi_reduction <add>, %263, %cst_70 [1] : vector<1x16xf32> to vector<1xf32>
    %265 = vector.shape_cast %264 : vector<1xf32> to vector<1x1xf32>
    %266 = math.log %265 : vector<1x1xf32>
    %267 = arith.addf %260, %266 : vector<1x1xf32>
    %268 = vector.broadcast %267 : vector<1x1xf32> to vector<1x16xf32>
    %269 = arith.subf %258, %268 : vector<1x16xf32>
    %c5_71 = arith.constant 5 : index
    %c0_72 = arith.constant 0 : index
    %270 = vector.load %arg3[%c5_71, %c0_72] : memref<6x16xf32, #tpu.memory_space<vmem>>, vector<1x16xf32>
    tpu.vector_store %arg3[%c5_71, %c0_72], %269 {strides = array<i32>} : memref<6x16xf32, #tpu.memory_space<vmem>>, vector<1x16xf32>,
    %c0_73 = arith.constant 0 : index
    %c0_74 = arith.constant 0 : index
    %271 = vector.load %arg4[%c0_73, %c0_74] : memref<2x32xf32, #tpu.memory_space<vmem>>, vector<1x32xf32>
    tpu.vector_store %arg4[%c0_73, %c0_74], %247 {strides = array<i32>} : memref<2x32xf32, #tpu.memory_space<vmem>>, vector<1x32xf32>,
    %c1_75 = arith.constant 1 : index
    %c0_76 = arith.constant 0 : index
    %272 = vector.load %arg4[%c1_75, %c0_76] : memref<2x32xf32, #tpu.memory_space<vmem>>, vector<1x32xf32>
    tpu.vector_store %arg4[%c1_75, %c0_76], %245 {strides = array<i32>} : memref<2x32xf32, #tpu.memory_space<vmem>>, vector<1x32xf32>,
    return
  }
}

</mosaic_0001>

<bundles_post_ra>
// kernel: decoder_forward.1
= control target key start
LH: loop header
LB: loop body
LE: loop exit
PB: predicated region body
PF: predicated region fallthrough
CT: control target
= control target key end

     0   :  { %10 = vsyncpa [#allocation4], 0  ;;  %s2432_s0 = inlined_call_operand.vmem [shape: s32[6], index: 0, kind: input, shape index: {}]   ;;  %s2433_s1 = inlined_call_operand.vmem [shape: f32[80,128], index: 1, kind: input, shape index: {}]   ;;  %s2434_s2 = inlined_call_operand.vmem [shape: bf16[32,128], index: 2, kind: input, shape index: {}]   ;;  %s2435_s3 = inlined_call_operand.hbm [shape: f32[6,16], index: 3, kind: output, shape index: {0}]   ;;  %s2436_s4 = inlined_call_operand.vmem [shape: f32[2,32], index: 4, kind: output, shape index: {1}]  }
   0x1   :  { %11 = vsyncpa [#allocation3], 0  ;;  %s18_s17 = sshll.u32 %s2432_s0, 4  ;;  %s19_s17 = int_to_ptr.vmem [resolvable:$true] %s18_s17 }
   0x2   :  { %s2032_s18 = scalar_lea.vmem %s19_s17, 16  ;;  %p2037_p1 = scmp.lt.s32.totalorder %s19_s17, %s19_s17 }
   0x3   :  { %p2033_p0 = scmp.ne.s32.totalorder %s19_s17, %s2032_s18  ;;  %p2038_p2 = scmp.lt.s32.totalorder %s2032_s18, %s2032_s18 }
   0x5   :  { %p2039_p3 = por %p2038_p2, %p2037_p1 }
   0x7   :  { %p2040_p4 = pnand %p2039_p3, %p2033_p0 }
   0x9   :  { %2043 = shalt.err (!%p2040_p4)
}
   0xa   :  { %s2070_s19 = smov [#allocation2]  }
   0xb   :  { %21 = dma.vmem_to_smem %s19_s17, 16, %s2070_s19, [#allocation4]  }
   0xc   :  { %2066 = dma.done.wait [#allocation4], 16  }
   0xd   :  { %2067 = vsyncadd [#allocation4], 4294967280 }
   0xe   :  { %29 = sfence }
   0xf   :  { %v2109_v0 = vld [vmem:[%s2434_s2] sm:$0xff]   ;;  %v2071_v1 = vmov 0.0   ;;  %v2116_v2 = vld [vmem:[%s2434_s2 + $0x8] sm:$0xff]   ;;  %vm2072_vm0 = vmmov 0   ;;  %vm78_vm1 = vcmask 261120   ;;  %s45_s2 = sld [smem:[#allocation2]] }
  0x10   :  { %1674 = vmatprep.subr.bf16.mxu0 %v2071_v1  ;;  %1678 = vmatprep.mubr.msk.bf16.mxu0 %vm2072_vm0, %v2071_v1  ;;  %v63_v3 = vld [vmem:[%s2433_s1 + $0x8] sm:$0x1]  ;;  %s2073_s28 = smov 64   ;;  %v64_v12 = vld [vmem:[%s2433_s1 + $0x9] sm:$0x1]  ;;  %s2074_s5 = smov 32  }
  0x11   :  { %1675 = vmatpush3.bf16.msra.mxu0 %v2109_v0  ;;  %1690 = vmatprep.mubr.msk.f32.mxu1 %vm2072_vm0, %v2071_v1  ;;  %v65_v4 = vpack.c.bf16 %v63_v3, %v63_v3  ;;  %v35_v23 = vld [vmem:[%s2433_s1 + $0x10] sm:$0xff]  ;;  %v36_v24 = vld [vmem:[%s2433_s1 + $0x18] sm:$0xff]  ;;  %v37_v25 = vld [vmem:[%s2433_s1 + $0x20] sm:$0xff]  ;;  %v2075_v26 = vmov 0.0|0.0   ;;  %s1559_s0 = sld [smem:[#allocation2 + $0x1]]  ;;  %s1560_s26 = sld [smem:[#allocation2 + $0x2]] }
  0x12   :  { %1676 = vmatprep.subr.bf16.mxu0 %v2071_v1  ;;  %1854 = vmatprep.subr.bf16.mxu1 %v2075_v26  ;;  %v2152_v27 = vpack.c.bf16 %v36_v24, %v35_v23  ;;  %v38_v28 = vld [vmem:[%s2433_s1 + $0x28] sm:$0xff]  ;;  %v39_v31 = vld [vmem:[%s2433_s1 + $0x30] sm:$0xff]  ;;  %v40_v32 = vld [vmem:[%s2433_s1 + $0x38] sm:$0xff]  ;;  %s1561_s6 = sld [smem:[#allocation2 + $0x3]]  ;;  %s1562_s10 = sld [smem:[#allocation2 + $0x4]]  ;;  %vm306_vm2 = vcmask 122880  }
  0x13   :  { %v2159_v29 = vpack.c.bf16 %v38_v28, %v37_v25  ;;  %v2171_v33 = vpack.c.bf16 %v40_v32, %v39_v31  ;;  %v41_v39 = vld [vmem:[%s2433_s1 + $0x40] sm:$0xff]  ;;  %v42_v40 = vld [vmem:[%s2433_s1 + $0x48] sm:$0xff]  ;;  %s1563_s14 = sld [smem:[#allocation2 + $0x5]]  ;;  %vm1527_vm3 = vcmask 253952  }
  0x14   :  { %1856 = vmatpush3.bf16.msra.mxu1 %v2152_v27  ;;  %v2195_v41 = vpack.c.bf16 %v42_v40, %v41_v39  ;;  %v2204_v42 = vld [vmem:[%s2433_s1 + $0xa] sm:$0x1] }
  0x15   :  { %1677 = vmatpush3.bf16.msra.mxu0 %v2116_v2  ;;  %s46_s27 = scalar_lea.vmem %s2433_s1, %s45_s2  ;;  %1857 = vmatprep.subr.bf16.mxu1 %v2075_v26 }
  0x16   :  { %v47_v5 = vld [vmem:[%s46_s27] sm:$0x1]  ;;  %1860 = vmatprep.subr.bf16.mxu0 %v2075_v26 }
  0x17   :  { %s49_s25 = scalar_lea.vmem %s2433_s1, %s1559_s0  ;;  %s52_s30 = scalar_lea.vmem %s2433_s1, %s1560_s26 }
  0x18   :  { %1679 = vmatmul.mubr.msk.bf16.vlgmr.msra.gmra.mrb[0].mxu0 %vm78_vm1, %v65_v4  ;;  %1859 = vmatpush3.bf16.msra.mxu1 %v2159_v29  ;;  %v50_v47 = vld [vmem:[%s49_s25] sm:$0x1]  ;;  %s55_s9 = scalar_lea.vmem %s2433_s1, %s1561_s6  ;;  %s58_s13 = scalar_lea.vmem %s2433_s1, %s1562_s10 }
  0x19   :  { %1701 = vmatprep.mubr.msk.f32.mxu0 %vm2072_vm0, %v2071_v1  ;;  %1704 = vmatprep.subr.bf16.mxu1 %v2071_v1  ;;  %s61_s17 = scalar_lea.vmem %s2433_s1, %s1563_s14 }
  0x1a   :  { %1862 = vmatpush3.bf16.msra.mxu0 %v2171_v33 }
  0x1b   :  { %1863 = vmatprep.subr.bf16.mxu0 %v2075_v26 }
  0x1e   :  { %1865 = vmatpush3.bf16.msra.mxu0 %v2195_v41 }
  0x1f   :  { %1866 = vmatprep.subr.bf16.mxu0 %v2075_v26 }
  0xeb   :  { %v116_v6 = vpop.f32.mrb[0].mxu0 }
  0xec   :  { %v122_v7 = vadd.f32 %v116_v6, %v47_v5  ;;  %v1680_v8 = vpop.f32.mrb[1].mxu0 }
  0xed   :  { %v119_v9 = vpop.f32.mrb[2].mxu0 }
  0xee   :  { %1936 = vtanh.f32 %v122_v7  ;;  %v1681_v10 = vpop.f32.mrb[3].mxu0  ;;  %v1567_v13 = vmul.f32 -1.442695, %v122_v7 }
  0xf0   :  { %1938 = vpow2.f32 %v1567_v13 }
  0xf8   :  { %v1937_v11 = vpop.eup %1936 }
  0xf9   :  { %136 = vrot.lane.b32.xlu0 %v1937_v11, %s2073_s28 }
  0xfa   :  { %v1939_v14 = vpop.eup %1938 }
  0xfb   :  { %v126_v15 = vadd.f32 1.0, %v1939_v14  ;;  %v53_v14 = vld [vmem:[%s52_s30] sm:$0x1] }
  0xfd   :  { %131 = vrot.lane.b32.xlu0 %v64_v12, %s2074_s5  ;;  %1940 = vrcp.f32 %v126_v15 }
 0x107   :  { %v1941_v16 = vpop.eup %1940 }
 0x16b   :  { %v137_v17 = vpop.permute.xlu0 %136 }
 0x16c   :  { %v139_v18 = vmul.f32 %v1941_v16, %v137_v17 }
 0x16e   :  { %141 = vrot.lane.b32.xlu1 %v139_v18, %s2074_s5 }
 0x16f   :  { %v132_v19 = vpop.permute.xlu0 %131 }
 0x170   :  { %v134_v20 = vmul.f32 %v1941_v16, %v132_v19 }
 0x1e0   :  { %v142_v21 = vpop.permute.xlu1 %141 }
 0x1e1   :  { %v2139_v22 = vadd.f32 %v142_v21, %v134_v20 }
 0x1e3   :  { %1942 = vtanh.f32 %v2139_v22 }
 0x1ed   :  { %v1943_v30 = vpop.eup %1942 }
 0x1ee   :  { %147 = vrot.lane.b32.xlu1 %v1943_v30, %s2073_s28 }
 0x260   :  { %v148_v34 = vpop.permute.xlu1 %147 }
 0x261   :  { %v150_v35 = vmul.f32 %v1941_v16, %v148_v34 }
 0x263   :  { %v321_v36 = vpack.c.bf16 %v150_v35, %v150_v35  ;;  %152 = vrot.lane.b32.xlu0 %v150_v35, %s2074_s5 }
 0x265   :  { %323 = vrot.lane.b32.xlu1 %v321_v36, %s2074_s5 }
 0x2d5   :  { %v153_v37 = vpop.permute.xlu0 %152 }
 0x2d6   :  { %1691 = vmatmul.mubr.msk.f32.vlgmr.msra.gmra.mrb[0].mxu1 %vm78_vm1, %v153_v37 }
 0x2d7   :  { %1705 = vmatpush3.bf16.msra.mxu1 %v2109_v0  ;;  %1708 = vmatprep.mubr.msk.bf16.mxu1 %vm2072_vm0, %v2071_v1  ;;  %v324_v38 = vpop.permute.xlu1 %323 }
 0x2d8   :  { %1706 = vmatprep.subr.bf16.mxu1 %v2071_v1 }
 0x2db   :  { %1707 = vmatpush3.bf16.msra.mxu1 %v2116_v2 }
 0x2dc   :  { %1872 = vmatprep.subr.bf16.mxu1 %v2075_v26 }
 0x2de   :  { %1709 = vmatmul.mubr.msk.bf16.vlgmr.msra.gmra.mrb[4].mxu1 %vm78_vm1, %v324_v38 }
 0x2df   :  { %1874 = vmatpush3.bf16.msra.mxu1 %v2171_v33  ;;  %1731 = vmatprep.mubr.msk.f32.mxu1 %vm2072_vm0, %v2071_v1 }
 0x2e0   :  { %1875 = vmatprep.subr.bf16.mxu1 %v2075_v26 }
 0x2e3   :  { %1877 = vmatpush3.bf16.msra.mxu1 %v2195_v41 }
 0x2e4   :  { %1878 = vmatprep.subr.bf16.mxu1 %v2075_v26 }
 0x3a9   :  { %v222_v43 = vpop.f32.mrb[0].mxu1 }
 0x3aa   :  { %v223_v44 = vadd.f32 %v222_v43, %v2204_v42  ;;  %v1692_v45 = vpop.f32.mrb[1].mxu1 }
 0x3ac   :  { %v226_v46 = vmax.f32 %v223_v44, 0.0 }
 0x3ae   :  { %1702 = vmatmul.mubr.msk.f32.vlgmr.msra.gmra.mrb[4].mxu0 %vm78_vm1, %v226_v46 }
 0x3af   :  { %1868 = vmatpush3.bf16.msra.mxu0 %v2152_v27  ;;  %1720 = vmatprep.mubr.msk.f32.mxu0 %vm2072_vm0, %v2071_v1 }
 0x3b0   :  { %1869 = vmatprep.subr.bf16.mxu0 %v2075_v26 }
 0x3b1   :  { %v362_v48 = vpop.f32.mrb[4].mxu1 }
 0x3b2   :  { %v368_v49 = vadd.f32 %v362_v48, %v50_v47  ;;  %v1710_v50 = vpop.f32.mrb[5].mxu1  ;;  %v56_v48 = vld [vmem:[%s55_s9] sm:$0x1] }
 0x3b3   :  { %v365_v51 = vpop.f32.mrb[6].mxu1  ;;  %1871 = vmatpush3.bf16.msra.mxu0 %v2159_v29 }
 0x3b4   :  { %1944 = vtanh.f32 %v368_v49  ;;  %v1711_v52 = vpop.f32.mrb[7].mxu1  ;;  %1734 = vmatprep.subr.bf16.mxu0 %v2071_v1  ;;  %v1572_v54 = vmul.f32 -1.442695, %v368_v49 }
 0x3b6   :  { %1946 = vpow2.f32 %v1572_v54 }
 0x3be   :  { %v1945_v53 = vpop.eup %1944 }
 0x3bf   :  { %378 = vrot.lane.b32.xlu0 %v1945_v53, %s2073_s28 }
 0x3c0   :  { %v1947_v55 = vpop.eup %1946 }
 0x3c1   :  { %v372_v56 = vadd.f32 1.0, %v1947_v55 }
 0x3c3   :  { %1948 = vrcp.f32 %v372_v56 }
 0x3cd   :  { %v1949_v57 = vpop.eup %1948 }
 0x3ce   :  { %v376_v62 = vmul.f32 %v1949_v57, %v2139_v22 }
 0x431   :  { %v379_v58 = vpop.permute.xlu0 %378 }
 0x432   :  { %v381_v59 = vmul.f32 %v1949_v57, %v379_v58 }
 0x434   :  { %383 = vrot.lane.b32.xlu1 %v381_v59, %s2074_s5 }
 0x481   :  { %v2219_v60 = vpop.f32.mrb[4].mxu0 }
 0x482   :  { %v1703_v61 = vpop.f32.mrb[5].mxu0 }
 0x4a6   :  { %v384_v63 = vpop.permute.xlu1 %383 }
 0x4a7   :  { %v386_v3 = vadd.f32 %v384_v63, %v376_v62 }
 0x4a9   :  { %1950 = vtanh.f32 %v386_v3 }
 0x4b3   :  { %v1951_v4 = vpop.eup %1950 }
 0x4b4   :  { %389 = vrot.lane.b32.xlu0 %v1951_v4, %s2073_s28 }
 0x526   :  { %v390_v5 = vpop.permute.xlu0 %389 }
 0x527   :  { %v392_v6 = vmul.f32 %v1949_v57, %v390_v5 }
 0x529   :  { %v562_v7 = vpack.c.bf16 %v392_v6, %v392_v6  ;;  %394 = vrot.lane.b32.xlu1 %v392_v6, %s2074_s5 }
 0x52b   :  { %564 = vrot.lane.b32.xlu0 %v562_v7, %s2074_s5 }
 0x59b   :  { %v395_v8 = vpop.permute.xlu1 %394 }
 0x59c   :  { %1721 = vmatmul.mubr.msk.f32.vlgmr.msra.gmra.mrb[6].mxu0 %vm78_vm1, %v395_v8 }
 0x59d   :  { %1735 = vmatpush3.bf16.msra.mxu0 %v2109_v0  ;;  %1738 = vmatprep.mubr.msk.bf16.mxu0 %vm2072_vm0, %v2071_v1  ;;  %v565_v9 = vpop.permute.xlu0 %564 }
 0x59e   :  { %1736 = vmatprep.subr.bf16.mxu0 %v2071_v1 }
 0x5a1   :  { %1737 = vmatpush3.bf16.msra.mxu0 %v2116_v2 }
 0x5a2   :  { %1884 = vmatprep.subr.bf16.mxu0 %v2075_v26 }
 0x5a4   :  { %1739 = vmatmul.mubr.msk.bf16.vlgmr.msra.gmra.mrb[8].mxu0 %vm78_vm1, %v565_v9 }
 0x5a5   :  { %1886 = vmatpush3.bf16.msra.mxu0 %v2171_v33  ;;  %1761 = vmatprep.mubr.msk.f32.mxu0 %vm2072_vm0, %v2071_v1 }
 0x5a6   :  { %1887 = vmatprep.subr.bf16.mxu0 %v2075_v26 }
 0x5a9   :  { %1889 = vmatpush3.bf16.msra.mxu0 %v2195_v41 }
 0x5aa   :  { %1890 = vmatprep.subr.bf16.mxu0 %v2075_v26 }
 0x66f   :  { %v464_v10 = vpop.f32.mrb[6].mxu0 }
 0x670   :  { %v465_v11 = vadd.f32 %v464_v10, %v2204_v42  ;;  %v1722_v12 = vpop.f32.mrb[7].mxu0 }
 0x672   :  { %v468_v13 = vmax.f32 %v465_v11, 0.0 }
 0x674   :  { %1732 = vmatmul.mubr.msk.f32.vlgmr.msra.gmra.mrb[2].mxu1 %vm78_vm1, %v468_v13 }
 0x675   :  { %1880 = vmatpush3.bf16.msra.mxu1 %v2152_v27  ;;  %1750 = vmatprep.mubr.msk.f32.mxu1 %vm2072_vm0, %v2071_v1 }
 0x676   :  { %1881 = vmatprep.subr.bf16.mxu1 %v2075_v26 }
 0x677   :  { %v603_v15 = vpop.f32.mrb[8].mxu0 }
 0x678   :  { %v609_v16 = vadd.f32 %v603_v15, %v53_v14  ;;  %v1740_v17 = vpop.f32.mrb[9].mxu0 }
 0x679   :  { %v606_v18 = vpop.f32.mrb[10].mxu0  ;;  %1883 = vmatpush3.bf16.msra.mxu1 %v2159_v29 }
 0x67a   :  { %1952 = vtanh.f32 %v609_v16  ;;  %v1741_v19 = vpop.f32.mrb[11].mxu0  ;;  %1764 = vmatprep.subr.bf16.mxu1 %v2071_v1  ;;  %v1577_v21 = vmul.f32 -1.442695, %v609_v16  ;;  %v59_v16 = vld [vmem:[%s58_s13] sm:$0x1] }
 0x67c   :  { %1954 = vpow2.f32 %v1577_v21 }
 0x684   :  { %v1953_v20 = vpop.eup %1952 }
 0x685   :  { %619 = vrot.lane.b32.xlu1 %v1953_v20, %s2073_s28 }
 0x686   :  { %v1955_v22 = vpop.eup %1954 }
 0x687   :  { %v613_v23 = vadd.f32 1.0, %v1955_v22 }
 0x689   :  { %1956 = vrcp.f32 %v613_v23 }
 0x693   :  { %v1957_v24 = vpop.eup %1956 }
 0x694   :  { %v617_v32 = vmul.f32 %v1957_v24, %v386_v3 }
 0x6f7   :  { %v620_v25 = vpop.permute.xlu1 %619 }
 0x6f8   :  { %v622_v28 = vmul.f32 %v1957_v24, %v620_v25 }
 0x6fa   :  { %624 = vrot.lane.b32.xlu0 %v622_v28, %s2074_s5 }
 0x747   :  { %v2252_v30 = vpop.f32.mrb[2].mxu1 }
 0x748   :  { %v1733_v31 = vpop.f32.mrb[3].mxu1 }
 0x76c   :  { %v625_v34 = vpop.permute.xlu0 %624 }
 0x76d   :  { %v627_v35 = vadd.f32 %v625_v34, %v617_v32 }
 0x76f   :  { %1958 = vtanh.f32 %v627_v35 }
 0x779   :  { %v1959_v36 = vpop.eup %1958 }
 0x77a   :  { %630 = vrot.lane.b32.xlu1 %v1959_v36, %s2073_s28 }
 0x7ec   :  { %v631_v37 = vpop.permute.xlu1 %630 }
 0x7ed   :  { %v633_v38 = vmul.f32 %v1957_v24, %v631_v37 }
 0x7ef   :  { %v803_v39 = vpack.c.bf16 %v633_v38, %v633_v38  ;;  %635 = vrot.lane.b32.xlu0 %v633_v38, %s2074_s5 }
 0x7f1   :  { %805 = vrot.lane.b32.xlu1 %v803_v39, %s2074_s5 }
 0x861   :  { %v636_v40 = vpop.permute.xlu0 %635 }
 0x862   :  { %1751 = vmatmul.mubr.msk.f32.vlgmr.msra.gmra.mrb[8].mxu1 %vm78_vm1, %v636_v40 }
 0x863   :  { %1765 = vmatpush3.bf16.msra.mxu1 %v2109_v0  ;;  %1768 = vmatprep.mubr.msk.bf16.mxu1 %vm2072_vm0, %v2071_v1  ;;  %v806_v43 = vpop.permute.xlu1 %805 }
 0x864   :  { %1766 = vmatprep.subr.bf16.mxu1 %v2071_v1 }
 0x867   :  { %1767 = vmatpush3.bf16.msra.mxu1 %v2116_v2 }
 0x868   :  { %1896 = vmatprep.subr.bf16.mxu1 %v2075_v26 }
 0x86a   :  { %1769 = vmatmul.mubr.msk.bf16.vlgmr.msra.gmra.mrb[12].mxu1 %vm78_vm1, %v806_v43 }
 0x86b   :  { %1898 = vmatpush3.bf16.msra.mxu1 %v2171_v33  ;;  %1791 = vmatprep.mubr.msk.f32.mxu1 %vm2072_vm0, %v2071_v1 }
 0x86c   :  { %1899 = vmatprep.subr.bf16.mxu1 %v2075_v26 }
 0x86f   :  { %1901 = vmatpush3.bf16.msra.mxu1 %v2195_v41 }
 0x870   :  { %1902 = vmatprep.subr.bf16.mxu1 %v2075_v26 }
 0x935   :  { %v705_v44 = vpop.f32.mrb[8].mxu1 }
 0x936   :  { %v706_v45 = vadd.f32 %v705_v44, %v2204_v42  ;;  %v1752_v46 = vpop.f32.mrb[9].mxu1 }
 0x938   :  { %v709_v47 = vmax.f32 %v706_v45, 0.0 }
 0x93a   :  { %1762 = vmatmul.mubr.msk.f32.vlgmr.msra.gmra.mrb[12].mxu0 %vm78_vm1, %v709_v47 }
 0x93b   :  { %1892 = vmatpush3.bf16.msra.mxu0 %v2152_v27  ;;  %1780 = vmatprep.mubr.msk.f32.mxu0 %vm2072_vm0, %v2071_v1 }
 0x93c   :  { %1893 = vmatprep.subr.bf16.mxu0 %v2075_v26 }
 0x93d   :  { %v844_v49 = vpop.f32.mrb[12].mxu1 }
 0x93e   :  { %v850_v50 = vadd.f32 %v844_v49, %v56_v48  ;;  %v1770_v51 = vpop.f32.mrb[13].mxu1 }
 0x93f   :  { %v847_v52 = vpop.f32.mrb[14].mxu1  ;;  %1895 = vmatpush3.bf16.msra.mxu0 %v2159_v29 }
 0x940   :  { %1960 = vtanh.f32 %v850_v50  ;;  %v1771_v53 = vpop.f32.mrb[15].mxu1  ;;  %1794 = vmatprep.subr.bf16.mxu0 %v2071_v1  ;;  %v1582_v55 = vmul.f32 -1.442695, %v850_v50 }
 0x942   :  { %1962 = vpow2.f32 %v1582_v55 }
 0x94a   :  { %v1961_v54 = vpop.eup %1960 }
 0x94b   :  { %860 = vrot.lane.b32.xlu0 %v1961_v54, %s2073_s28 }
 0x94c   :  { %v1963_v56 = vpop.eup %1962 }
 0x94d   :  { %v854_v57 = vadd.f32 1.0, %v1963_v56 }
 0x94f   :  { %1964 = vrcp.f32 %v854_v57 }
 0x959   :  { %v1965_v58 = vpop.eup %1964 }
 0x95a   :  { %v858_v3 = vmul.f32 %v1965_v58, %v627_v35 }
 0x9bd   :  { %v861_v59 = vpop.permute.xlu0 %860 }
 0x9be   :  { %v863_v61 = vmul.f32 %v1965_v58, %v861_v59 }
 0x9c0   :  { %865 = vrot.lane.b32.xlu1 %v863_v61, %s2074_s5 }
 0xa0d   :  { %v2284_v62 = vpop.f32.mrb[12].mxu0 }
 0xa0e   :  { %v1763_v63 = vpop.f32.mrb[13].mxu0 }
 0xa0f   :  { %v2351_v63 = vld [vmem:[%s2433_s1 + $0xb] sm:$0x1] }
 0xa32   :  { %v866_v4 = vpop.permute.xlu1 %865 }
 0xa33   :  { %v868_v5 = vadd.f32 %v866_v4, %v858_v3  ;;  %v297_v3 = vadd.f32 %v2219_v60, %v2351_v63 }
 0xa35   :  { %1966 = vtanh.f32 %v868_v5  ;;  %v1570_v4 = vmul.f32 -1.442695, %v297_v3 }
 0xa3f   :  { %v1967_v6 = vpop.eup %1966 }
 0xa40   :  { %871 = vrot.lane.b32.xlu0 %v1967_v6, %s2073_s28 }
 0xab2   :  { %v872_v7 = vpop.permute.xlu0 %871 }
 0xab3   :  { %v874_v8 = vmul.f32 %v1965_v58, %v872_v7 }
 0xab5   :  { %v1044_v9 = vpack.c.bf16 %v874_v8, %v874_v8  ;;  %876 = vrot.lane.b32.xlu1 %v874_v8, %s2074_s5 }
 0xab7   :  { %1046 = vrot.lane.b32.xlu0 %v1044_v9, %s2074_s5 }
 0xb27   :  { %v877_v10 = vpop.permute.xlu1 %876 }
 0xb28   :  { %1781 = vmatmul.mubr.msk.f32.vlgmr.msra.gmra.mrb[14].mxu0 %vm78_vm1, %v877_v10 }
 0xb29   :  { %1795 = vmatpush3.bf16.msra.mxu0 %v2109_v0  ;;  %1798 = vmatprep.mubr.msk.bf16.mxu0 %vm2072_vm0, %v2071_v1  ;;  %v1047_v11 = vpop.permute.xlu0 %1046 }
 0xb2a   :  { %1796 = vmatprep.subr.bf16.mxu0 %v2071_v1 }
 0xb2d   :  { %1797 = vmatpush3.bf16.msra.mxu0 %v2116_v2 }
 0xb2e   :  { %1908 = vmatprep.subr.bf16.mxu0 %v2075_v26 }
 0xb30   :  { %1799 = vmatmul.mubr.msk.bf16.vlgmr.msra.gmra.mrb[16].mxu0 %vm78_vm1, %v1047_v11 }
 0xb31   :  { %1910 = vmatpush3.bf16.msra.mxu0 %v2171_v33  ;;  %1821 = vmatprep.mubr.msk.f32.mxu0 %vm2072_vm0, %v2071_v1 }
 0xb32   :  { %1911 = vmatprep.subr.bf16.mxu0 %v2075_v26 }
 0xb35   :  { %1913 = vmatpush3.bf16.msra.mxu0 %v2195_v41 }
 0xb36   :  { %1914 = vmatprep.subr.bf16.mxu0 %v2075_v26 }
 0xbfb   :  { %v946_v12 = vpop.f32.mrb[14].mxu0 }
 0xbfc   :  { %v947_v13 = vadd.f32 %v946_v12, %v2204_v42  ;;  %v1782_v14 = vpop.f32.mrb[15].mxu0 }
 0xbfe   :  { %v950_v15 = vmax.f32 %v947_v13, 0.0 }
 0xc00   :  { %1792 = vmatmul.mubr.msk.f32.vlgmr.msra.gmra.mrb[10].mxu1 %vm78_vm1, %v950_v15 }
 0xc01   :  { %1904 = vmatpush3.bf16.msra.mxu1 %v2152_v27  ;;  %1810 = vmatprep.mubr.msk.f32.mxu1 %vm2072_vm0, %v2071_v1 }
 0xc02   :  { %1905 = vmatprep.subr.bf16.mxu1 %v2075_v26 }
 0xc03   :  { %v1085_v17 = vpop.f32.mrb[16].mxu0 }
 0xc04   :  { %v1091_v18 = vadd.f32 %v1085_v17, %v59_v16  ;;  %v1800_v19 = vpop.f32.mrb[17].mxu0 }
 0xc05   :  { %v1088_v20 = vpop.f32.mrb[18].mxu0  ;;  %1907 = vmatpush3.bf16.msra.mxu1 %v2159_v29 }
 0xc06   :  { %1968 = vtanh.f32 %v1091_v18  ;;  %v1801_v21 = vpop.f32.mrb[19].mxu0  ;;  %1824 = vmatprep.subr.bf16.mxu1 %v2071_v1  ;;  %v1587_v23 = vmul.f32 -1.442695, %v1091_v18  ;;  %v539_v20 = vadd.f32 %v2252_v30, %v2351_v63 }
 0xc08   :  { %1970 = vpow2.f32 %v1587_v23  ;;  %v1575_v23 = vmul.f32 -1.442695, %v539_v20 }
 0xc10   :  { %v1969_v22 = vpop.eup %1968 }
 0xc11   :  { %1101 = vrot.lane.b32.xlu1 %v1969_v22, %s2073_s28 }
 0xc12   :  { %v1971_v24 = vpop.eup %1970 }
 0xc13   :  { %v1095_v25 = vadd.f32 1.0, %v1971_v24 }
 0xc15   :  { %1972 = vrcp.f32 %v1095_v25 }
 0xc1f   :  { %v1973_v28 = vpop.eup %1972 }
 0xc20   :  { %v1099_v36 = vmul.f32 %v1973_v28, %v868_v5  ;;  %v780_v5 = vadd.f32 %v2284_v62, %v2351_v63 }
 0xc22   :  { %v1580_v7 = vmul.f32 -1.442695, %v780_v5 }
 0xc83   :  { %v1102_v31 = vpop.permute.xlu1 %1101 }
 0xc84   :  { %v1104_v32 = vmul.f32 %v1973_v28, %v1102_v31 }
 0xc86   :  { %1106 = vrot.lane.b32.xlu0 %v1104_v32, %s2074_s5 }
 0xcd3   :  { %v2316_v34 = vpop.f32.mrb[10].mxu1 }
 0xcd4   :  { %v1793_v35 = vpop.f32.mrb[11].mxu1  ;;  %v1021_v8 = vadd.f32 %v2316_v34, %v2351_v63 }
 0xcd6   :  { %v1585_v9 = vmul.f32 -1.442695, %v1021_v8 }
 0xcf8   :  { %v1107_v37 = vpop.permute.xlu0 %1106 }
 0xcf9   :  { %v1109_v38 = vadd.f32 %v1107_v37, %v1099_v36 }
 0xcfb   :  { %1974 = vtanh.f32 %v1109_v38 }
 0xd05   :  { %v1975_v39 = vpop.eup %1974 }
 0xd06   :  { %1112 = vrot.lane.b32.xlu1 %v1975_v39, %s2073_s28 }
 0xd78   :  { %v1113_v40 = vpop.permute.xlu1 %1112 }
 0xd79   :  { %v1115_v43 = vmul.f32 %v1973_v28, %v1113_v40 }
 0xd7b   :  { %v1285_v44 = vpack.c.bf16 %v1115_v43, %v1115_v43  ;;  %1117 = vrot.lane.b32.xlu0 %v1115_v43, %s2074_s5 }
 0xd7d   :  { %1287 = vrot.lane.b32.xlu1 %v1285_v44, %s2074_s5 }
 0xded   :  { %v1118_v45 = vpop.permute.xlu0 %1117 }
 0xdee   :  { %1811 = vmatmul.mubr.msk.f32.vlgmr.msra.gmra.mrb[16].mxu1 %vm78_vm1, %v1118_v45 }
 0xdef   :  { %1825 = vmatpush3.bf16.msra.mxu1 %v2109_v0  ;;  %1828 = vmatprep.mubr.msk.bf16.mxu1 %vm2072_vm0, %v2071_v1  ;;  %v1288_v46 = vpop.permute.xlu1 %1287 }
 0xdf0   :  { %1826 = vmatprep.subr.bf16.mxu1 %v2071_v1 }
 0xdf3   :  { %1827 = vmatpush3.bf16.msra.mxu1 %v2116_v2 }
 0xdf4   :  { %1920 = vmatprep.subr.bf16.mxu1 %v2075_v26 }
 0xdf6   :  { %1829 = vmatmul.mubr.msk.bf16.vlgmr.msra.gmra.mrb[20].mxu1 %vm78_vm1, %v1288_v46 }
 0xdf7   :  { %1922 = vmatpush3.bf16.msra.mxu1 %v2171_v33  ;;  %1851 = vmatprep.mubr.msk.f32.mxu1 %vm2072_vm0, %v2071_v1  ;;  %v62_v33 = vld [vmem:[%s61_s17] sm:$0x1] }
 0xdf8   :  { %1923 = vmatprep.subr.bf16.mxu1 %v2075_v26 }
 0xdfb   :  { %1925 = vmatpush3.bf16.msra.mxu1 %v2195_v41 }
 0xec1   :  { %v1187_v0 = vpop.f32.mrb[16].mxu1 }
 0xec2   :  { %v1188_v47 = vadd.f32 %v1187_v0, %v2204_v42  ;;  %v1812_v48 = vpop.f32.mrb[17].mxu1 }
 0xec4   :  { %v1191_v2 = vmax.f32 %v1188_v47, 0.0 }
 0xec6   :  { %1822 = vmatmul.mubr.msk.f32.vlgmr.msra.gmra.mrb[20].mxu0 %vm78_vm1, %v1191_v2 }
 0xec7   :  { %1916 = vmatpush3.bf16.msra.mxu0 %v2152_v27  ;;  %1840 = vmatprep.mubr.msk.f32.mxu0 %vm2072_vm0, %v2071_v1 }
 0xec8   :  { %1917 = vmatprep.subr.bf16.mxu0 %v2075_v26 }
 0xec9   :  { %v1326_v41 = vpop.f32.mrb[20].mxu1 }
 0xeca   :  { %v1332_v49 = vadd.f32 %v1326_v41, %v62_v33  ;;  %v1830_v50 = vpop.f32.mrb[21].mxu1 }
 0xecb   :  { %v1329_v51 = vpop.f32.mrb[22].mxu1  ;;  %1919 = vmatpush3.bf16.msra.mxu0 %v2159_v29 }
 0xecc   :  { %1976 = vtanh.f32 %v1332_v49  ;;  %v1831_v52 = vpop.f32.mrb[23].mxu1  ;;  %v1592_v54 = vmul.f32 -1.442695, %v1332_v49 }
 0xece   :  { %1978 = vpow2.f32 %v1592_v54 }
 0xed6   :  { %v1977_v53 = vpop.eup %1976 }
 0xed7   :  { %1342 = vrot.lane.b32.xlu0 %v1977_v53, %s2073_s28 }
 0xed8   :  { %v1979_v55 = vpop.eup %1978 }
 0xed9   :  { %v1336_v27 = vadd.f32 1.0, %v1979_v55 }
 0xedb   :  { %1980 = vrcp.f32 %v1336_v27 }
 0xee5   :  { %v1981_v56 = vpop.eup %1980 }
 0xee6   :  { %v1340_v59 = vmul.f32 %v1981_v56, %v1109_v38 }
 0xf49   :  { %v1343_v1 = vpop.permute.xlu0 %1342 }
 0xf4a   :  { %v1345_v57 = vmul.f32 %v1981_v56, %v1343_v1 }
 0xf4c   :  { %1347 = vrot.lane.b32.xlu1 %v1345_v57, %s2074_s5 }
 0xf99   :  { %v1261_v26 = vpop.f32.mrb[20].mxu0 }
 0xf9a   :  { %v1823_v58 = vpop.f32.mrb[21].mxu0  ;;  %v1262_v24 = vadd.f32 %v1261_v26, %v2351_v63 }
 0xf9c   :  { %v1590_v25 = vmul.f32 -1.442695, %v1262_v24 }
 0xfbe   :  { %v1348_v61 = vpop.permute.xlu1 %1347 }
 0xfbf   :  { %v2346_v29 = vadd.f32 %v1348_v61, %v1340_v59 }
 0xfc1   :  { %1982 = vtanh.f32 %v2346_v29 }
 0xfc2   :  { %1984 = vpow2.f32 %v1570_v4 }
 0xfc3   :  { %1986 = vpow2.f32 %v1580_v7 }
 0xfc4   :  { %1988 = vpow2.f32 %v1585_v9 }
 0xfcb   :  { %v1983_v6 = vpop.eup %1982 }
 0xfcc   :  { %1353 = vrot.lane.b32.xlu0 %v1983_v6, %s2073_s28  ;;  %v1985_v10 = vpop.eup %1984 }
 0xfcd   :  { %v303_v11 = vadd.f32 1.0, %v1985_v10  ;;  %v1987_v12 = vpop.eup %1986 }
 0xfce   :  { %v786_v60 = vadd.f32 1.0, %v1987_v12  ;;  %v1989_v13 = vpop.eup %1988 }
 0xfcf   :  { %1990 = vrcp.f32 %v303_v11  ;;  %v1027_v14 = vadd.f32 1.0, %v1989_v13 }
 0xfd0   :  { %1992 = vrcp.f32 %v786_v60 }
 0xfd1   :  { %1994 = vrcp.f32 %v1027_v14 }
 0xfd2   :  { %1996 = vpow2.f32 %v1575_v23 }
 0xfd3   :  { %1998 = vpow2.f32 %v1590_v25 }
 0xfd9   :  { %v2361_v62 = vpop.eup %1990 }
 0xfda   :  { %v307_v15 = vsel %vm306_vm2, %v2361_v62, -inf  ;;  %v2365_v16 = vpop.eup %1992 }
 0xfdb   :  { %v789_v17 = vsel %vm306_vm2, %v2365_v16, -inf  ;;  %v2369_v18 = vpop.eup %1994 }
 0xfdc   :  { %v1030_v19 = vsel %vm306_vm2, %v2369_v18, -inf  ;;  %v1997_v28 = vpop.eup %1996 }
 0xfdd   :  { %v545_v31 = vadd.f32 1.0, %v1997_v28  ;;  %v1999_v32 = vpop.eup %1998 }
 0xfde   :  { %v1268_v34 = vadd.f32 1.0, %v1999_v32 }
 0xfdf   :  { %2000 = vrcp.f32 %v545_v31 }
 0xfe0   :  { %2002 = vrcp.f32 %v1268_v34 }
 0xfe9   :  { %v2377_v35 = vpop.eup %2000 }
 0xfea   :  { %v548_v30 = vsel %vm306_vm2, %v2377_v35, -inf  ;;  %v2003_v36 = vpop.eup %2002 }
 0xfeb   :  { %308 = vmax.xlane.f32.xlu0 %v307_v15  ;;  %v1271_v37 = vsel %vm306_vm2, %v2003_v36, -inf }
 0xfef   :  { %790 = vmax.xlane.f32.xlu0 %v789_v17 }
 0xff3   :  { %1031 = vmax.xlane.f32.xlu0 %v1030_v19 }
0x103e   :  { %v1354_v21 = vpop.permute.xlu0 %1353 }
0x103f   :  { %v1356_v22 = vmul.f32 %v1981_v56, %v1354_v21 }
0x1041   :  { %1358 = vrot.lane.b32.xlu1 %v1356_v22, %s2074_s5  ;;  %s2076_s5 = smov 96  }
0x1065   :  { %549 = vmax.xlane.f32.xlu1 %v548_v30 }
0x1069   :  { %1272 = vmax.xlane.f32.xlu1 %v1271_v37 }
0x1078   :  { %v309_v38 = vpop.xlane.xlu0 %308 }
0x1079   :  { %v310_v39 = vsub.f32 %v2361_v62, %v309_v38 }
0x107b   :  { %v311_v40 = vmul.f32 1.442695, %v310_v39 }
0x107c   :  { %v791_v43 = vpop.xlane.xlu0 %790 }
0x107d   :  { %2004 = vpow2.f32 %v311_v40  ;;  %v792_v44 = vsub.f32 %v2365_v16, %v791_v43 }
0x107f   :  { %v793_v45 = vmul.f32 1.442695, %v792_v44 }
0x1080   :  { %v1032_v14 = vpop.xlane.xlu0 %1031 }
0x1081   :  { %2006 = vpow2.f32 %v793_v45  ;;  %v1033_v15 = vsub.f32 %v2369_v18, %v1032_v14 }
0x1083   :  { %v1034_v19 = vmul.f32 1.442695, %v1033_v15 }
0x1087   :  { %v2005_v46 = vpop.eup %2004 }
0x1088   :  { %v313_v0 = vsel %vm306_vm2, %v2005_v46, 0.0 }
0x1089   :  { %314 = vadd.xlane.f32.xlu1 %v313_v0 }
0x108b   :  { %v2007_v47 = vpop.eup %2006 }
0x108c   :  { %v795_v48 = vsel %vm306_vm2, %v2007_v47, 0.0 }
0x108d   :  { %796 = vadd.xlane.f32.xlu1 %v795_v48 }
0x10b3   :  { %v1359_v2 = vpop.permute.xlu1 %1358 }
0x10b4   :  { %1841 = vmatmul.mubr.msk.f32.vlgmr.msra.gmra.mrb[22].mxu0 %vm78_vm1, %v1359_v2  ;;  %1528 = vst.msk [vmem:[%s2436_s4] sm:$0x1] %vm1527_vm3, %v1359_v2 }
0x10f2   :  { %v2391_v33 = vpop.xlane.xlu1 %549 }
0x10f3   :  { %v551_v13 = vsub.f32 %v2377_v35, %v2391_v33 }
0x10f6   :  { %v1273_v41 = vpop.xlane.xlu1 %1272 }
0x10f7   :  { %v1274_v49 = vsub.f32 %v2003_v36, %v1273_v41 }
0x10f9   :  { %v1275_v50 = vmul.f32 1.442695, %v1274_v49 }
0x10fb   :  { %2008 = vpow2.f32 %v1275_v50 }
0x1105   :  { %v2009_v51 = vpop.eup %2008 }
0x1106   :  { %v1277_v52 = vsel %vm306_vm2, %v2009_v51, 0.0 }
0x1107   :  { %1278 = vadd.xlane.f32.xlu1 %v1277_v52 }
0x1116   :  { %v315_v53 = vpop.xlane.xlu1 %314 }
0x1117   :  { %2010 = vlog2.f32 %v315_v53 }
0x1118   :  { %1530 = vrot.lane.b32.xlu1 %v2346_v29, %s2076_s5 }
0x111a   :  { %v797_v54 = vpop.xlane.xlu1 %796 }
0x111b   :  { %2012 = vlog2.f32 %v797_v54 }
0x1121   :  { %v2011_v55 = vpop.eup %2010 }
0x1122   :  { %v317_v27 = vmul.f32 0.6931472, %v2011_v55 }
0x1124   :  { %v318_v56 = vadd.f32 %v317_v27, %v309_v38 }
0x1125   :  { %v2013_v1 = vpop.eup %2012 }
0x1126   :  { %v319_v57 = vsub.f32 %v2361_v62, %v318_v56  ;;  %v799_v26 = vmul.f32 0.6931472, %v2013_v1 }
0x1128   :  { %320 = vst.msk [vmem:[#allocation5] sm:$0x1] %vm306_vm2, %v319_v57  ;;  %v800_v58 = vadd.f32 %v799_v26, %v791_v43 }
0x112a   :  { %v801_v59 = vsub.f32 %v2365_v16, %v800_v58  ;;  %v552_v16 = vmul.f32 1.442695, %v551_v13 }
0x112c   :  { %802 = vst.msk [vmem:[#allocation5 + $0x2] sm:$0x1] %vm306_vm2, %v801_v59 }
0x1187   :  { %v1428_v61 = vpop.f32.mrb[22].mxu0 }
0x1188   :  { %v1429_v3 = vadd.f32 %v1428_v61, %v2204_v42  ;;  %v1842_v29 = vpop.f32.mrb[23].mxu0 }
0x118a   :  { %v1432_v4 = vmax.f32 %v1429_v3, 0.0 }
0x118c   :  { %1852 = vmatmul.mubr.msk.f32.vlgmr.msra.gmra.mrb[18].mxu1 %vm78_vm1, %v1432_v4 }
0x1194   :  { %v1279_v5 = vpop.xlane.xlu1 %1278 }
0x1195   :  { %2014 = vlog2.f32 %v1279_v5 }
0x1198   :  { %v1531_v6 = vpop.permute.xlu1 %1530 }
0x1199   :  { %1533 = vst.msk [vmem:[%s2436_s4 + $0x1] sm:$0x1] %vm1527_vm3, %v1531_v6  ;;  %s2077_s4 = smov [#allocation5]  }
0x119a   :  { %s1540_s0 = sshll.u32 %s2077_s4, 4  ;;  %s1541_s0 = int_to_ptr.vmem [resolvable:$true] %s1540_s0 }
0x119b   :  { %s2044_s22 = scalar_lea.vmem %s1541_s0, 128  ;;  %p2049_p6 = scmp.lt.s32.totalorder %s1541_s0, %s1541_s0 }
0x119c   :  { %p2045_p5 = scmp.ne.s32.totalorder %s1541_s0, %s2044_s22  ;;  %p2050_p7 = scmp.lt.s32.totalorder %s2044_s22, %s2044_s22 }
0x119e   :  { %p2051_p8 = por %p2050_p7, %p2049_p6 }
0x119f   :  { %v2015_v7 = vpop.eup %2014 }
0x11a0   :  { %v1281_v8 = vmul.f32 0.6931472, %v2015_v7  ;;  %p2052_p9 = pnand %p2051_p8, %p2045_p5 }
0x11a2   :  { %v1282_v9 = vadd.f32 %v1281_v8, %v1273_v41 }
0x11a4   :  { %v1283_v10 = vsub.f32 %v2003_v36, %v1282_v9 }
0x11a6   :  { %1284 = vst.msk [vmem:[#allocation5 + $0x4] sm:$0x1] %vm306_vm2, %v1283_v10 }
0x125f   :  { %v1502_v11 = vpop.f32.mrb[18].mxu1 }
0x1260   :  { %v1503_v42 = vadd.f32 %v1502_v11, %v2351_v63  ;;  %v1853_v12 = vpop.f32.mrb[19].mxu1 }
0x1262   :  { %v1595_v60 = vmul.f32 -1.442695, %v1503_v42 }
0x1264   :  { %2016 = vpow2.f32 %v1595_v60 }
0x126e   :  { %v2017_v62 = vpop.eup %2016 }
0x126f   :  { %v1509_v17 = vadd.f32 1.0, %v2017_v62 }
0x1271   :  { %2018 = vrcp.f32 %v1509_v17 }
0x1272   :  { %2020 = vpow2.f32 %v552_v16 }
0x1273   :  { %2022 = vpow2.f32 %v1034_v19 }
0x127b   :  { %v2019_v20 = vpop.eup %2018 }
0x127c   :  { %v1512_v21 = vsel %vm306_vm2, %v2019_v20, -inf  ;;  %v2021_v63 = vpop.eup %2020 }
0x127d   :  { %1513 = vmax.xlane.f32.xlu0 %v1512_v21  ;;  %v554_v22 = vsel %vm306_vm2, %v2021_v63, 0.0  ;;  %v2023_v23 = vpop.eup %2022 }
0x127e   :  { %v1036_v24 = vsel %vm306_vm2, %v2023_v23, 0.0 }
0x1281   :  { %555 = vadd.xlane.f32.xlu0 %v554_v22 }
0x1285   :  { %1037 = vadd.xlane.f32.xlu0 %v1036_v24 }
0x130a   :  { %v1514_v25 = vpop.xlane.xlu0 %1513 }
0x130b   :  { %v1515_v28 = vsub.f32 %v2019_v20, %v1514_v25 }
0x130d   :  { %v1516_v31 = vmul.f32 1.442695, %v1515_v28 }
0x130e   :  { %v556_v32 = vpop.xlane.xlu0 %555 }
0x130f   :  { %2024 = vpow2.f32 %v1516_v31 }
0x1310   :  { %2026 = vlog2.f32 %v556_v32 }
0x1312   :  { %v1038_v34 = vpop.xlane.xlu0 %1037 }
0x1313   :  { %2028 = vlog2.f32 %v1038_v34 }
0x1319   :  { %v2025_v30 = vpop.eup %2024 }
0x131a   :  { %v2027_v36 = vpop.eup %2026  ;;  %v1518_v37 = vsel %vm306_vm2, %v2025_v30, 0.0 }
0x131b   :  { %v558_v38 = vmul.f32 0.6931472, %v2027_v36  ;;  %1519 = vadd.xlane.f32.xlu0 %v1518_v37 }
0x131d   :  { %v2029_v39 = vpop.eup %2028  ;;  %v559_v40 = vadd.f32 %v558_v38, %v2391_v33 }
0x131e   :  { %v1040_v43 = vmul.f32 0.6931472, %v2029_v39 }
0x131f   :  { %v560_v44 = vsub.f32 %v2377_v35, %v559_v40 }
0x1320   :  { %v1041_v45 = vadd.f32 %v1040_v43, %v1032_v14 }
0x1321   :  { %561 = vst.msk [vmem:[#allocation5 + $0x1] sm:$0x1] %vm306_vm2, %v560_v44 }
0x1322   :  { %v1042_v46 = vsub.f32 %v2369_v18, %v1041_v45 }
0x1324   :  { %1043 = vst.msk [vmem:[#allocation5 + $0x3] sm:$0x1] %vm306_vm2, %v1042_v46 }
0x13a8   :  { %v1520_v0 = vpop.xlane.xlu0 %1519 }
0x13a9   :  { %2030 = vlog2.f32 %v1520_v0 }
0x13b3   :  { %v2031_v47 = vpop.eup %2030 }
0x13b4   :  { %v1522_v48 = vmul.f32 0.6931472, %v2031_v47 }
0x13b6   :  { %v1523_v2 = vadd.f32 %v1522_v48, %v1514_v25 }
0x13b8   :  { %v1524_v41 = vsub.f32 %v2019_v20, %v1523_v2 }
0x13ba   :  { %1525 = vst.msk [vmem:[#allocation5 + $0x5] sm:$0x1] %vm306_vm2, %v1524_v41 }
0x13bb   :  { %2055 = shalt.err (!%p2052_p9)
}
0x13bc   :  { %s2056_s2 = scalar_lea.hbm %s2435_s3, 128 }
0x13bd   :  { %p2057_p10 = scmp.ne.s32.totalorder %s2435_s3, %s2056_s2  ;;  %p2060_p11 = scmp.lt.u32.totalorder %s2056_s2, %s2435_s3 }
0x13bf   :  { %p2062_p12 = pnand %p2060_p11, %p2057_p10 }
0x13c1   :  { %2065 = shalt.err (!%p2062_p12)
}
0x13c2   :  { %1543 = dma.vmem_to_hbm [thread:$0]  %s1541_s0, 128, %s2435_s3, [#allocation3]  }
0x13c3   :  { %2068 = dma.done.wait [#allocation3], 128  }
0x13c4   :  { %2069 = vsyncadd [#allocation3], 4294967168 }
0x13c5   :  { %1551 = vsyncpa [#allocation3], 1 }
0x13c6   :  { %1552 = vsyncpa [#allocation4], 1 }

</bundles_post_ra>
